<compile_context>
chip_gen: v5e
topology: v5e:2x2
jax: 0.10.0
libtpu: 0.0.40
codegen_flags: <defaults>
</compile_context>

<pallas_src>
import functools

import jax
import jax.numpy as jnp
from jax.experimental import pallas as pl
from jax.experimental.pallas import tpu as pltpu

HID1, HID2, GRU_H = 256, 64, 32
W_COLS = 256        # lane width of the packed weight / bias blobs
SLAB = 128          # lane width of the packed output slab
# output slab layout: cols [0:na]=mean, [na]=std, [64:64+GRU_H]=h_new, rest zero


def _round_up(v, m):
    return (v + m - 1) // m * m


def _row_offsets(num_inputs):
    o1 = 0                              # fc1 weight rows
    o2 = o1 + _round_up(num_inputs, 8)  # fc2 weight rows
    o3 = o2 + HID1                      # fused GRU weight rows (x-part then h-part)
    o4 = o3 + (HID2 + GRU_H)            # fused head weight rows
    rows = o4 + GRU_H
    return o1, o2, o3, o4, rows


# ----------------------------------------------------------------------------- kernel
def mk_a3c_kernel(x_ref, h_ref, w_ref, b_ref, out_ref, *, nin, na):
    f32 = jnp.float32
    o1, o2, o3, o4, _ = _row_offsets(nin)
    wdt = w_ref.dtype  # bf16 weights: cast activation operands, accumulate f32

    def mm(a, w, precision=None):
        return jnp.dot(a.astype(wdt), w, preferred_element_type=f32,
                       precision=precision)

    x = x_ref[...].astype(f32)
    h = h_ref[...].astype(f32)

    # fc1 + relu
    x1 = jnp.maximum(mm(x, w_ref[o1:o1 + nin, 0:HID1]) + b_ref[0:1, 0:HID1], 0.0)

    # fc2 + relu
    x2 = jnp.maximum(mm(x1, w_ref[o2:o2 + HID1, 0:HID2]) + b_ref[1:2, 0:HID2], 0.0)

    # Fused GRUCell (PyTorch semantics): two accumulating dots into one f32
    # accumulator (no lane-dim concat of [x2, h]):
    #   cols [0:32]  = W_ir x + W_hr h           (r pre-act; b_ir+b_hr pre-summed)
    #   cols [32:64] = W_iz x + W_hz h           (z pre-act; b_iz+b_hz pre-summed)
    #   cols [64:96] = W_in x + b_in
    #   cols [96:128]= W_hn h + b_hn             (kept separate: multiplied by r)
    g = (mm(x2, w_ref[o3:o3 + HID2, 0:4 * GRU_H])
         + mm(h, w_ref[o3 + HID2:o3 + HID2 + GRU_H, 0:4 * GRU_H])
         + b_ref[2:3, 0:4 * GRU_H])                               # (B, 128)

    # one 64-lane sigmoid for r and z (tanh form: single EUP op, no divide)
    rz = 0.5 * (jnp.tanh(0.5 * g[:, 0:2 * GRU_H]) + 1.0)
    r = rz[:, 0:GRU_H]
    z = rz[:, GRU_H:2 * GRU_H]
    n = jnp.tanh(g[:, 2 * GRU_H:3 * GRU_H] + r * g[:, 3 * GRU_H:4 * GRU_H])
    h_new = (1.0 - z) * n + z * h

    # Fused head matmul also lays out the output slab:
    #   cols [0:na] = actor mean, col [na] = critic logit,
    #   cols [64:96] = h_new (identity block in packed weight), rest zero.
    # precision=HIGHEST keeps the h_new pass-through exact in the f32 path.
    prec = jax.lax.Precision.HIGHEST if wdt == f32 else None
    slab = (mm(h_new, w_ref[o4:o4 + GRU_H, 0:SLAB], precision=prec)
            + b_ref[3:4, 0:SLAB])                                 # (B, 128)

    # exp only on the critic column, single unmasked lane-dense store.
    lane = jax.lax.broadcasted_iota(jnp.int32, slab.shape, 1)
    out_ref[...] = jnp.where(lane == na, jnp.exp(slab), slab)


# ----------------------------------------------------------------------------- wrapper
def mk_a3c_forward(x, h, wblob, bblob, num_actions):
    B, nin = x.shape
    na = num_actions
    assert na + 1 <= 64, "slab layout assumes num_actions + 1 <= 64"

    # Batch tile: one grid step up to 512 rows (per-step overhead dominates at
    # these FLOP counts); above that, >=2 steps of <=1024 rows so v7x megacore
    # feeds both TensorCores while v5e/v6e amortize per-step overhead.
    if B <= 512:
        bb = B
    else:
        bb = min(1024, _round_up(-(-B // 2), 8))
    B_pad = _round_up(B, bb)
    if B_pad != B:
        pad = B_pad - B
        x = jnp.pad(x, ((0, pad), (0, 0)))
        h = jnp.pad(h, ((0, pad), (0, 0)))
    grid = (B_pad // bb,)

    kernel = functools.partial(mk_a3c_kernel, nin=nin, na=na)
    slab = pl.pallas_call(
        kernel,
        out_shape=jax.ShapeDtypeStruct((B_pad, SLAB), jnp.float32),
        grid=grid,
        in_specs=[
            pl.BlockSpec((bb, nin), lambda i: (i, 0)),            # x
            pl.BlockSpec((bb, GRU_H), lambda i: (i, 0)),          # h
            pl.BlockSpec(wblob.shape, lambda i: (0, 0)),          # weights, VMEM-resident
            pl.BlockSpec(bblob.shape, lambda i: (0, 0)),          # biases, VMEM-resident
        ],
        out_specs=pl.BlockSpec((bb, SLAB), lambda i: (i, 0)),
        compiler_params=pltpu.CompilerParams(
            dimension_semantics=("parallel",)),
    )(x, h, wblob, bblob)

    mean = slab[:B, 0:na]
    std = jnp.broadcast_to(slab[:B, na:na + 1], (B, na))
    h_new = slab[:B, 64:64 + GRU_H]
    return mean, std, h_new


# ----------------------------------------------------------------------------- params
def init_params(key, num_inputs, num_actions):
    """PyTorch-like uniform init; weights stored (in, out), biases (1, out)."""
    def lin(key, fan_in, fan_out):
        k1, k2 = jax.random.split(key)
        bound = 1.0 / jnp.sqrt(fan_in)
        w = jax.random.uniform(k1, (fan_in, fan_out), jnp.float32, -bound, bound)
        b = jax.random.uniform(k2, (1, fan_out), jnp.float32, -bound, bound)
        return w, b

    keys = jax.random.split(key, 6)
    w1, b1 = lin(keys[0], num_inputs, HID1)
    w2, b2 = lin(keys[1], HID1, HID2)
    wih, bih = lin(keys[2], HID2, 3 * GRU_H)        # GRUCell weight_ih.T / bias_ih
    whh, bhh = lin(keys[3], GRU_H, 3 * GRU_H)       # GRUCell weight_hh.T / bias_hh
    wa, ba = lin(keys[4], GRU_H, num_actions)
    wc, bc = lin(keys[5], GRU_H, 1)
    return dict(w1=w1, b1=b1, w2=w2, b2=b2, wih=wih, bih=bih, whh=whh, bhh=bhh,
                wa=wa, ba=ba, wc=wc, bc=bc)


def pack_params(p, num_inputs, num_actions, weights_dtype=jnp.float32):
    """Pack all weights into one (rows, 256) blob and all biases into one (8, 256) blob.

    weights_dtype=jnp.bfloat16 enables the v6e/v7x fast MXU path (biases and
    all post-matmul math stay f32 in the kernel).
    """
    nin, na = num_inputs, num_actions
    o1, o2, o3, o4, rows = _row_offsets(nin)
    H = GRU_H

    wblob = jnp.zeros((rows, W_COLS), jnp.float32)
    wblob = wblob.at[o1:o1 + nin, 0:HID1].set(p["w1"])
    wblob = wblob.at[o2:o2 + HID1, 0:HID2].set(p["w2"])
    # fused GRU weight: rows [o3:o3+HID2] act on x2, rows [o3+HID2:...] act on h,
    # gate columns [r | z | i_n | h_n]
    wih, whh = p["wih"], p["whh"]
    wblob = wblob.at[o3:o3 + HID2, 0:H].set(wih[:, 0:H])                       # W_ir
    wblob = wblob.at[o3 + HID2:o3 + HID2 + H, 0:H].set(whh[:, 0:H])            # W_hr
    wblob = wblob.at[o3:o3 + HID2, H:2 * H].set(wih[:, H:2 * H])               # W_iz
    wblob = wblob.at[o3 + HID2:o3 + HID2 + H, H:2 * H].set(whh[:, H:2 * H])    # W_hz
    wblob = wblob.at[o3:o3 + HID2, 2 * H:3 * H].set(wih[:, 2 * H:3 * H])       # W_in
    wblob = wblob.at[o3 + HID2:o3 + HID2 + H, 3 * H:4 * H].set(whh[:, 2 * H:3 * H])  # W_hn
    # fused head + output-slab layout: [wa | wc | 0 ... | I_32 | 0 ...]
    wblob = wblob.at[o4:o4 + H, 0:na].set(p["wa"])
    wblob = wblob.at[o4:o4 + H, na:na + 1].set(p["wc"])
    wblob = wblob.at[o4:o4 + H, 64:64 + H].set(jnp.eye(H, dtype=jnp.float32))

    bblob = jnp.zeros((8, W_COLS), jnp.float32)
    bblob = bblob.at[0, 0:HID1].set(p["b1"].reshape(-1))
    bblob = bblob.at[1, 0:HID2].set(p["b2"].reshape(-1))
    bih = p["bih"].reshape(-1)
    bhh = p["bhh"].reshape(-1)
    bg = jnp.concatenate([
        bih[0:H] + bhh[0:H],             # r gate bias (b_ir + b_hr)
        bih[H:2 * H] + bhh[H:2 * H],     # z gate bias (b_iz + b_hz)
        bih[2 * H:3 * H],                # b_in
        bhh[2 * H:3 * H],                # b_hn (kept separate: multiplied by r)
    ])
    bblob = bblob.at[2, 0:4 * H].set(bg)
    bblob = bblob.at[3, 0:na].set(p["ba"].reshape(-1))
    bblob = bblob.at[3, na].set(p["bc"].reshape(-1)[0])
    return wblob.astype(weights_dtype), bblob


# ----------------------------------------------------------------------------- reference
def reference_forward(x, h, p):
    x1 = jnp.maximum(x @ p["w1"] + p["b1"], 0.0)
    x2 = jnp.maximum(x1 @ p["w2"] + p["b2"], 0.0)
    gi = x2 @ p["wih"] + p["bih"]
    gh = h @ p["whh"] + p["bhh"]
    r = jax.nn.sigmoid(gi[:, :GRU_H] + gh[:, :GRU_H])
    z = jax.nn.sigmoid(gi[:, GRU_H:2 * GRU_H] + gh[:, GRU_H:2 * GRU_H])
    n = jnp.tanh(gi[:, 2 * GRU_H:] + r * gh[:, 2 * GRU_H:])
    h_new = (1.0 - z) * n + z * h
    mean = h_new @ p["wa"] + p["ba"]
    std = jnp.exp(h_new @ p["wc"] + p["bc"])
    return mean, jnp.broadcast_to(std, mean.shape), h_new


if __name__ == "__main__":
    num_inputs, num_actions, batch = 32, 4, 4

    key = jax.random.PRNGKey(0)
    kx, kh, kp = jax.random.split(key, 3)
    x = jax.random.normal(kx, (batch, num_inputs), jnp.float32)
    h0 = jax.random.normal(kh, (batch, GRU_H), jnp.float32)
    params = init_params(kp, num_inputs, num_actions)

    # ---- f32 weight path (exact h_new pass-through) ----
    wblob, bblob = pack_params(params, num_inputs, num_actions)
    mean, std, h1 = mk_a3c_forward(x, h0, wblob, bblob, num_actions)
    jax.block_until_ready((mean, std, h1))

    r_mean, r_std, r_h1 = reference_forward(x, h0, params)
    assert jnp.allclose(mean, r_mean, atol=1e-4)
    assert jnp.allclose(std, r_std, atol=1e-4)
    assert jnp.allclose(h1, r_h1, atol=1e-4)

    # ---- bf16 weight path (v6e/v7x fast MXU path), loose tolerance ----
    wblob_bf, bblob_f = pack_params(params, num_inputs, num_actions,
                                    weights_dtype=jnp.bfloat16)
    mean_b, std_b, h1_b = mk_a3c_forward(x, h0, wblob_bf, bblob_f, num_actions)
    jax.block_until_ready((mean_b, std_b, h1_b))
    assert jnp.allclose(mean_b, r_mean, atol=0.05, rtol=0.05)
    assert jnp.allclose(std_b, r_std, atol=0.05, rtol=0.05)
    assert jnp.allclose(h1_b, r_h1, atol=0.05, rtol=0.05)

    # TODO(synk): act()/update() (Normal sampling, log_prob, returns/loss/optimizer)
    # are host-side training-loop logic, not part of the forward kernel.
    print("KERNEL_OK")
</pallas_src>

<mosaic_0001>
module attributes {stable_mosaic.version = 11 : i64} {
  func.func @mk_a3c_kernel(%arg0: i32, %arg1: memref<4x32xf32, #tpu.memory_space<vmem>>, %arg2: memref<4x32xf32, #tpu.memory_space<vmem>>, %arg3: memref<416x256xf32, #tpu.memory_space<vmem>>, %arg4: memref<8x256xf32, #tpu.memory_space<vmem>>, %arg5: memref<4x128xf32, #tpu.memory_space<vmem>>) attributes {dimension_semantics = [#tpu.dimension_semantics<parallel>], iteration_bounds = array<i64: 1>, scalar_prefetch = 0 : i64, scratch_operands = 0 : i64, tpu.core_type = #tpu.core_type<tc>, window_params = [{transform_indices = @transform_0, window_bounds = array<i64: 4, 32>}, {transform_indices = @transform_1, window_bounds = array<i64: 4, 32>}, {pipeline_mode = #tpu.pipeline_mode<synchronous>, transform_indices = @transform_2, window_bounds = array<i64: 416, 256>}, {pipeline_mode = #tpu.pipeline_mode<synchronous>, transform_indices = @transform_3, window_bounds = array<i64: 8, 256>}, {transform_indices = @transform_4, window_bounds = array<i64: 4, 128>}]} {
    %c0 = arith.constant 0 : index
    %c0_0 = arith.constant 0 : index
    %0 = vector.load %arg1[%c0, %c0_0] : memref<4x32xf32, #tpu.memory_space<vmem>>, vector<4x32xf32>
    %c0_1 = arith.constant 0 : index
    %c0_2 = arith.constant 0 : index
    %1 = vector.load %arg2[%c0_1, %c0_2] : memref<4x32xf32, #tpu.memory_space<vmem>>, vector<4x32xf32>
    %c0_3 = arith.constant 0 : index
    %c0_4 = arith.constant 0 : index
    %2 = vector.load %arg3[%c0_3, %c0_4] : memref<416x256xf32, #tpu.memory_space<vmem>>, vector<32x256xf32>
    %cst = arith.constant dense<0.000000e+00> : vector<4x256xf32>
    %3 = tpu.matmul %0, %2, %cst {dimension_numbers = #tpu.dot_dimension_numbers<[1], [0], [0], [1], [0, 0, 1, 1], [], []>} : vector<4x32xf32>, vector<32x256xf32>, vector<4x256xf32> -> vector<4x256xf32>
    %c0_5 = arith.constant 0 : index
    %c0_6 = arith.constant 0 : index
    %4 = vector.load %arg4[%c0_5, %c0_6] : memref<8x256xf32, #tpu.memory_space<vmem>>, vector<1x256xf32>
    %5 = vector.broadcast %4 : vector<1x256xf32> to vector<4x256xf32>
    %6 = arith.addf %3, %5 : vector<4x256xf32>
    %cst_7 = arith.constant 0.000000e+00 : f32
    %7 = vector.broadcast %cst_7 : f32 to vector<4x256xf32>
    %8 = arith.maximumf %6, %7 : vector<4x256xf32>
    %c32 = arith.constant 32 : index
    %c0_8 = arith.constant 0 : index
    %9 = vector.load %arg3[%c32, %c0_8] : memref<416x256xf32, #tpu.memory_space<vmem>>, vector<256x64xf32>
    %cst_9 = arith.constant dense<0.000000e+00> : vector<4x64xf32>
    %10 = tpu.matmul %8, %9, %cst_9 {dimension_numbers = #tpu.dot_dimension_numbers<[1], [0], [0], [1], [0, 0, 1, 1], [], []>} : vector<4x256xf32>, vector<256x64xf32>, vector<4x64xf32> -> vector<4x64xf32>
    %c1 = arith.constant 1 : index
    %c0_10 = arith.constant 0 : index
    %11 = vector.load %arg4[%c1, %c0_10] : memref<8x256xf32, #tpu.memory_space<vmem>>, vector<1x64xf32>
    %12 = vector.broadcast %11 : vector<1x64xf32> to vector<4x64xf32>
    %13 = arith.addf %10, %12 : vector<4x64xf32>
    %cst_11 = arith.constant 0.000000e+00 : f32
    %14 = vector.broadcast %cst_11 : f32 to vector<4x64xf32>
    %15 = arith.maximumf %13, %14 : vector<4x64xf32>
    %c288 = arith.constant 288 : index
    %c0_12 = arith.constant 0 : index
    %16 = vector.load %arg3[%c288, %c0_12] : memref<416x256xf32, #tpu.memory_space<vmem>>, vector<64x128xf32>
    %cst_13 = arith.constant dense<0.000000e+00> : vector<4x128xf32>
    %17 = tpu.matmul %15, %16, %cst_13 {dimension_numbers = #tpu.dot_dimension_numbers<[1], [0], [0], [1], [0, 0, 1, 1], [], []>} : vector<4x64xf32>, vector<64x128xf32>, vector<4x128xf32> -> vector<4x128xf32>
    %c352 = arith.constant 352 : index
    %c0_14 = arith.constant 0 : index
    %18 = vector.load %arg3[%c352, %c0_14] : memref<416x256xf32, #tpu.memory_space<vmem>>, vector<32x128xf32>
    %cst_15 = arith.constant dense<0.000000e+00> : vector<4x128xf32>
    %19 = tpu.matmul %1, %18, %cst_15 {dimension_numbers = #tpu.dot_dimension_numbers<[1], [0], [0], [1], [0, 0, 1, 1], [], []>} : vector<4x32xf32>, vector<32x128xf32>, vector<4x128xf32> -> vector<4x128xf32>
    %20 = arith.addf %17, %19 : vector<4x128xf32>
    %c2 = arith.constant 2 : index
    %c0_16 = arith.constant 0 : index
    %21 = vector.load %arg4[%c2, %c0_16] : memref<8x256xf32, #tpu.memory_space<vmem>>, vector<1x128xf32>
    %22 = vector.broadcast %21 : vector<1x128xf32> to vector<4x128xf32>
    %23 = arith.addf %20, %22 : vector<4x128xf32>
    %24 = vector.extract_strided_slice %23 {offsets = [0, 0], sizes = [4, 64], strides = [1, 1]} : vector<4x128xf32> to vector<4x64xf32>
    %cst_17 = arith.constant 5.000000e-01 : f32
    %25 = vector.broadcast %cst_17 : f32 to vector<4x64xf32>
    %26 = arith.mulf %25, %24 : vector<4x64xf32>
    %27 = math.tanh %26 : vector<4x64xf32>
    %cst_18 = arith.constant 1.000000e+00 : f32
    %28 = vector.broadcast %cst_18 : f32 to vector<4x64xf32>
    %29 = arith.addf %27, %28 : vector<4x64xf32>
    %cst_19 = arith.constant 5.000000e-01 : f32
    %30 = vector.broadcast %cst_19 : f32 to vector<4x64xf32>
    %31 = arith.mulf %30, %29 : vector<4x64xf32>
    %32 = vector.extract_strided_slice %31 {offsets = [0, 0], sizes = [4, 32], strides = [1, 1]} : vector<4x64xf32> to vector<4x32xf32>
    %33 = vector.extract_strided_slice %31 {offsets = [0, 32], sizes = [4, 32], strides = [1, 1]} : vector<4x64xf32> to vector<4x32xf32>
    %34 = vector.extract_strided_slice %23 {offsets = [0, 64], sizes = [4, 32], strides = [1, 1]} : vector<4x128xf32> to vector<4x32xf32>
    %35 = vector.extract_strided_slice %23 {offsets = [0, 96], sizes = [4, 32], strides = [1, 1]} : vector<4x128xf32> to vector<4x32xf32>
    %36 = arith.mulf %32, %35 : vector<4x32xf32>
    %37 = arith.addf %34, %36 : vector<4x32xf32>
    %38 = math.tanh %37 : vector<4x32xf32>
    %cst_20 = arith.constant 1.000000e+00 : f32
    %39 = vector.broadcast %cst_20 : f32 to vector<4x32xf32>
    %40 = arith.subf %39, %33 : vector<4x32xf32>
    %41 = arith.mulf %40, %38 : vector<4x32xf32>
    %42 = arith.mulf %33, %1 : vector<4x32xf32>
    %43 = arith.addf %41, %42 : vector<4x32xf32>
    %c384 = arith.constant 384 : index
    %c0_21 = arith.constant 0 : index
    %44 = vector.load %arg3[%c384, %c0_21] : memref<416x256xf32, #tpu.memory_space<vmem>>, vector<32x128xf32>
    %cst_22 = arith.constant dense<0.000000e+00> : vector<4x128xf32>
    %45 = tpu.matmul %43, %44, %cst_22 {dimension_numbers = #tpu.dot_dimension_numbers<[1], [0], [0], [1], [0, 0, 1, 1], [], []>, precision = #tpu.contract_precision<fp32>} : vector<4x32xf32>, vector<32x128xf32>, vector<4x128xf32> -> vector<4x128xf32>
    %c3 = arith.constant 3 : index
    %c0_23 = arith.constant 0 : index
    %46 = vector.load %arg4[%c3, %c0_23] : memref<8x256xf32, #tpu.memory_space<vmem>>, vector<1x128xf32>
    %47 = vector.broadcast %46 : vector<1x128xf32> to vector<4x128xf32>
    %48 = arith.addf %45, %47 : vector<4x128xf32>
    %49 = tpu.iota {dimensions = array<i32: 1>} : vector<4x128xi32>
    %c4_i32 = arith.constant 4 : i32
    %50 = vector.broadcast %c4_i32 : i32 to vector<4x128xi32>
    %51 = arith.cmpi eq, %49, %50 : vector<4x128xi32>
    %52 = math.exp %48 : vector<4x128xf32>
    %53 = arith.select %51, %52, %48 : vector<4x128xi1>, vector<4x128xf32>
    %c0_24 = arith.constant 0 : index
    %c0_25 = arith.constant 0 : index
    %54 = vector.load %arg5[%c0_24, %c0_25] : memref<4x128xf32, #tpu.memory_space<vmem>>, vector<4x128xf32>
    tpu.vector_store %arg5[%c0_24, %c0_25], %53 {strides = array<i32>} : memref<4x128xf32, #tpu.memory_space<vmem>>, vector<4x128xf32>,
    return
  }
  func.func @transform_0(%arg0: i32) -> (i32, i32) {
    %c0_i32 = arith.constant 0 : i32
    %c0_i32_0 = arith.constant 0 : i32
    return %arg0, %c0_i32 : i32, i32
  }
  func.func @transform_1(%arg0: i32) -> (i32, i32) {
    %c0_i32 = arith.constant 0 : i32
    %c0_i32_0 = arith.constant 0 : i32
    return %arg0, %c0_i32 : i32, i32
  }
  func.func @transform_2(%arg0: i32) -> (i32, i32) {
    %c0_i32 = arith.constant 0 : i32
    %c0_i32_0 = arith.constant 0 : i32
    %c0_i32_1 = arith.constant 0 : i32
    return %c0_i32, %c0_i32_0 : i32, i32
  }
  func.func @transform_3(%arg0: i32) -> (i32, i32) {
    %c0_i32 = arith.constant 0 : i32
    %c0_i32_0 = arith.constant 0 : i32
    %c0_i32_1 = arith.constant 0 : i32
    return %c0_i32, %c0_i32_0 : i32, i32
  }
  func.func @transform_4(%arg0: i32) -> (i32, i32) {
    %c0_i32 = arith.constant 0 : i32
    %c0_i32_0 = arith.constant 0 : i32
    return %arg0, %c0_i32 : i32, i32
  }
}

</mosaic_0001>

<bundles_post_ra>
// kernel: tpu_custom_call.1
= control target key start
LH: loop header
LB: loop body
LE: loop exit
PB: predicated region body
PF: predicated region fallthrough
CT: control target
= control target key end

     0   :  { %9 = vsyncpa [#allocation3], 0  ;;  %s721_s0 = inlined_call_operand.hbm [shape: f32[4,32], index: 0, kind: input, shape index: {}]   ;;  %s722_s1 = inlined_call_operand.hbm [shape: f32[4,32], index: 1, kind: input, shape index: {}]   ;;  %s723_s2 = inlined_call_operand.hbm [shape: f32[416,256], index: 2, kind: input, shape index: {}]   ;;  %s724_s3 = inlined_call_operand.hbm [shape: f32[8,256], index: 3, kind: input, shape index: {}]   ;;  %s725_s4 = inlined_call_operand.hbm [shape: f32[4,128], index: 4, kind: output, shape index: {}]  }
   0x1   :  { %10 = vsyncpa [#allocation6], 0 }
   0x2   :  { %11 = vsyncpa [#allocation9], 0  ;;  %s29_s17 = sshll.u32 %s722_s1, 4  ;;  %s30_s17 = int_to_ptr.hbm [resolvable:$true] %s29_s17 }
   0x3   :  { %12 = vsyncpa [#allocation4], 0  ;;  %s667_s18 = smov [#allocation5]   ;;  %s18_s22 = sshll.u32 %s721_s0, 4  ;;  %s19_s22 = int_to_ptr.hbm [resolvable:$true] %s18_s22 }
   0x4   :  { %s31_s19 = sshll.u32 %s667_s18, 4  ;;  %s668_s23 = smov [#allocation2]   ;;  %s32_s19 = int_to_ptr.vmem [resolvable:$true] %s31_s19 }
   0x5   :  { %34 = dma.hbm_to_vmem [thread:$0]  %s30_s17, 64, %s32_s19, [#allocation6]  }
   0x6   :  { %s20_s24 = sshll.u32 %s668_s23, 4  ;;  %s39_s27 = sshll.u32 %s723_s2, 4  ;;  %s21_s24 = int_to_ptr.vmem [resolvable:$true] %s20_s24  ;;  %s40_s27 = int_to_ptr.hbm [resolvable:$true] %s39_s27 }
   0x7   :  { %23 = dma.hbm_to_vmem [thread:$0]  %s19_s22, 64, %s21_s24, [#allocation3]  }
   0x8   :  { %s669_s1 = smov [#allocation7]   ;;  %s53_s5 = sshll.u32 %s724_s3, 4  ;;  %s54_s5 = int_to_ptr.hbm [resolvable:$true] %s53_s5 }
   0x9   :  { %s41_s28 = sshll.u32 %s669_s1, 4  ;;  %s670_s6 = smov 256   ;;  %s42_s28 = int_to_ptr.vmem [resolvable:$true] %s41_s28 }
   0xa   :  { %s671_s0 = smov 16   ;;  %s672_s7 = smov [#allocation8]  }
   0xb   :  { %47 = dma.hbm_to_vmem [thread:$0]  %s40_s27, 13312, %s42_s28, [#allocation6], %s670_s6, %s670_s6, %s671_s0  }
   0xc   :  { %s55_s8 = sshll.u32 %s672_s7, 4  ;;  %s56_s8 = int_to_ptr.vmem [resolvable:$true] %s55_s8 }
   0xd   :  { %58 = dma.hbm_to_vmem [thread:$0]  %s54_s5, 256, %s56_s8, [#allocation9]  }
   0xe   :  { %659 = dma.done.wait [#allocation3], 64  }
   0xf   :  { %660 = vsyncadd [#allocation3], 4294967232 }
  0x10   :  { %661 = dma.done.wait [#allocation6], 13376  }
  0x11   :  { %662 = vsyncadd [#allocation6], 4294953920 }
  0x12   :  { %663 = dma.done.wait [#allocation9], 256  }
  0x13   :  { %664 = vsyncadd [#allocation9], 4294967040  ;;  %v83_v0 = vld [vmem:[#allocation7 + $0x30] sm:$0xff]  ;;  %v81_v1 = vld [vmem:[#allocation7 + $0x20] sm:$0xff]  ;;  %vm91_vm0 = vcmask 261120   ;;  %vm246_vm1 = vcmask 523264  }
  0x14   :  { %v84_v2 = vld [vmem:[#allocation7 + $0x38] sm:$0xff]  ;;  %107 = vmatpush.msra.mxu0 %v83_v0  ;;  %v82_v3 = vld [vmem:[#allocation7 + $0x28] sm:$0xff]  ;;  %v79_v4 = vld [vmem:[#allocation7 + $0x10] sm:$0xff]  ;;  %s673_s2 = smov 32   ;;  %s674_s3 = smov 64  }
  0x15   :  { %127 = vmatpush.msra.mxu1 %v84_v2  ;;  %v80_v5 = vld [vmem:[#allocation7 + $0x18] sm:$0xff]  ;;  %v152_v6 = vld [vmem:[#allocation7 + $0x130] sm:$0xff]  ;;  %v151_v7 = vld [vmem:[#allocation7 + $0x120] sm:$0xff]  ;;  %s675_s9 = smov 96   ;;  %s676_s10 = smov [#allocation10]  }
  0x16   :  { %108 = vmatpush.msra.mxu0 %v81_v1  ;;  %v168_v8 = vld [vmem:[#allocation7 + $0x230] sm:$0xff]  ;;  %v77_v9 = vld [vmem:[#allocation7] sm:$0xff]  ;;  %v78_v10 = vld [vmem:[#allocation7 + $0x8] sm:$0xff]  ;;  %170 = vmatpush.msra.mxu2 %v152_v6  ;;  %s505_s11 = sshll.u32 %s676_s10, 4  ;;  %s507_s14 = sshll.u32 %s725_s4, 4  ;;  %s506_s11 = int_to_ptr.vmem [resolvable:$true] %s505_s11  ;;  %s508_s14 = int_to_ptr.hbm [resolvable:$true] %s507_s14 }
  0x17   :  { %128 = vmatpush.msra.mxu1 %v82_v3  ;;  %190 = vmatpush.msra.mxu3 %v168_v8  ;;  %v167_v11 = vld [vmem:[#allocation7 + $0x220] sm:$0xff]  ;;  %v75_v12 = vld [vmem:[#allocation2] sm:$0xf]  ;;  %v150_v13 = vld [vmem:[#allocation7 + $0x110] sm:$0xff] }
  0x18   :  { %109 = vmatpush.msra.mxu0 %v79_v4  ;;  %171 = vmatpush.msra.mxu2 %v151_v7  ;;  %v166_v14 = vld [vmem:[#allocation7 + $0x210] sm:$0xff]  ;;  %v149_v15 = vld [vmem:[#allocation7 + $0x100] sm:$0xff]  ;;  %v76_v62 = vld [vmem:[#allocation5] sm:$0xf] }
  0x19   :  { %129 = vmatpush.msra.mxu1 %v80_v5  ;;  %191 = vmatpush.msra.mxu3 %v167_v11  ;;  %v165_v16 = vld [vmem:[#allocation7 + $0x200] sm:$0xff]  ;;  %v148_v17 = vld [vmem:[#allocation7 + $0xf0] sm:$0xff] }
  0x1a   :  { %110 = vmatpush.msra.mxu0 %v77_v9  ;;  %172 = vmatpush.msra.mxu2 %v150_v13  ;;  %v164_v18 = vld [vmem:[#allocation7 + $0x1f0] sm:$0xff]  ;;  %v147_v19 = vld [vmem:[#allocation7 + $0xe0] sm:$0xff] }
  0x1b   :  { %130 = vmatpush.msra.mxu1 %v78_v10  ;;  %519 = vmatmul.msk.f32.vlgmr.msra.gmra.mxu0 %vm91_vm0, %v75_v12  ;;  %v163_v20 = vld [vmem:[#allocation7 + $0x1e0] sm:$0xff]  ;;  %v146_v21 = vld [vmem:[#allocation7 + $0xd0] sm:$0xff] }
  0x1c   :  { %520 = vmatmul.msk.f32.vlgmr.msra.gmra.mxu1 %vm91_vm0, %v75_v12  ;;  %192 = vmatpush.msra.mxu3 %v166_v14  ;;  %v162_v22 = vld [vmem:[#allocation7 + $0x1d0] sm:$0xff]  ;;  %v145_v23 = vld [vmem:[#allocation7 + $0xc0] sm:$0xff] }
  0x1d   :  { %173 = vmatpush.msra.mxu2 %v149_v15  ;;  %v161_v24 = vld [vmem:[#allocation7 + $0x1c0] sm:$0xff]  ;;  %v144_v25 = vld [vmem:[#allocation7 + $0xb0] sm:$0xff] }
  0x1e   :  { %193 = vmatpush.msra.mxu3 %v165_v16  ;;  %v160_v26 = vld [vmem:[#allocation7 + $0x1b0] sm:$0xff]  ;;  %v143_v27 = vld [vmem:[#allocation7 + $0xa0] sm:$0xff] }
  0x1f   :  { %174 = vmatpush.msra.mxu2 %v148_v17  ;;  %v159_v28 = vld [vmem:[#allocation7 + $0x1a0] sm:$0xff]  ;;  %v142_v29 = vld [vmem:[#allocation7 + $0x90] sm:$0xff] }
  0x20   :  { %194 = vmatpush.msra.mxu3 %v164_v18  ;;  %v158_v30 = vld [vmem:[#allocation7 + $0x190] sm:$0xff]  ;;  %v141_v31 = vld [vmem:[#allocation7 + $0x80] sm:$0xff] }
  0x21   :  { %175 = vmatpush.msra.mxu2 %v147_v19  ;;  %v157_v32 = vld [vmem:[#allocation7 + $0x180] sm:$0xff]  ;;  %v140_v33 = vld [vmem:[#allocation7 + $0x70] sm:$0xff] }
  0x22   :  { %195 = vmatpush.msra.mxu3 %v163_v20  ;;  %v139_v34 = vld [vmem:[#allocation7 + $0x60] sm:$0xff]  ;;  %v156_v35 = vld [vmem:[#allocation7 + $0x170] sm:$0xff] }
  0x23   :  { %176 = vmatpush.msra.mxu2 %v146_v21  ;;  %v138_v36 = vld [vmem:[#allocation7 + $0x50] sm:$0xff]  ;;  %v155_v37 = vld [vmem:[#allocation7 + $0x160] sm:$0xff] }
  0x24   :  { %196 = vmatpush.msra.mxu3 %v162_v22  ;;  %v137_v38 = vld [vmem:[#allocation7 + $0x40] sm:$0xff]  ;;  %v154_v39 = vld [vmem:[#allocation7 + $0x150] sm:$0xff] }
  0x25   :  { %177 = vmatpush.msra.mxu2 %v145_v23  ;;  %v153_v40 = vld [vmem:[#allocation7 + $0x140] sm:$0xff]  ;;  %v218_v41 = vld [vmem:[#allocation7 + $0x2b0] sm:$0xff] }
  0x26   :  { %197 = vmatpush.msra.mxu3 %v161_v24  ;;  %v217_v42 = vld [vmem:[#allocation7 + $0x2a0] sm:$0xff]  ;;  %258 = vmatpush.msrb.mxu1 %v218_v41  ;;  %v222_v43 = vld [vmem:[#allocation7 + $0x2f0] sm:$0xff] }
  0x27   :  { %178 = vmatpush.msra.mxu2 %v144_v25  ;;  %v216_v44 = vld [vmem:[#allocation7 + $0x290] sm:$0xff]  ;;  %238 = vmatpush.msrb.mxu0 %v222_v43  ;;  %v215_v45 = vld [vmem:[#allocation7 + $0x280] sm:$0xff] }
  0x28   :  { %198 = vmatpush.msra.mxu3 %v160_v26  ;;  %259 = vmatpush.msrb.mxu1 %v217_v42  ;;  %v85_v46 = vld [vmem:[#allocation8] ss:$8 sm:$0x3]  ;;  %v214_v55 = vld [vmem:[#allocation7 + $0x270] sm:$0xff]  ;;  %v169_v63 = vld [vmem:[#allocation8 + $0x1] ss:$0 sm:$0xff] }
  0x29   :  { %179 = vmatpush.msra.mxu2 %v143_v27  ;;  %v87_v47 = vperm.slane %v85_v46, 0  ;;  %v88_v48 = vperm.slane %v85_v46, 1  ;;  %v221_v56 = vld [vmem:[#allocation7 + $0x2e0] sm:$0xff]  ;;  %v220_v58 = vld [vmem:[#allocation7 + $0x2d0] sm:$0xff] }
  0x2a   :  { %199 = vmatpush.msra.mxu3 %v159_v28  ;;  %260 = vmatpush.msrb.mxu1 %v216_v44  ;;  %v213_v57 = vld [vmem:[#allocation7 + $0x260] sm:$0xff]  ;;  %v212_v59 = vld [vmem:[#allocation7 + $0x250] sm:$0xff] }
  0x2b   :  { %180 = vmatpush.msra.mxu2 %v142_v29  ;;  %239 = vmatpush.msrb.mxu0 %v221_v56  ;;  %v219_v60 = vld [vmem:[#allocation7 + $0x2c0] sm:$0xff]  ;;  %v301_v19 = vld [vmem:[#allocation7 + $0x330] sm:$0xff] }
  0x2c   :  { %200 = vmatpush.msra.mxu3 %v158_v30  ;;  %261 = vmatpush.msrb.mxu1 %v215_v45  ;;  %v211_v61 = vld [vmem:[#allocation7 + $0x240] sm:$0xff]  ;;  %v320_v21 = vand.u32 4294901760, %v301_v19  ;;  %v299_v30 = vld [vmem:[#allocation7 + $0x310] sm:$0xff] }
  0x2d   :  { %181 = vmatpush.msra.mxu2 %v141_v31  ;;  %240 = vmatpush.msrb.mxu0 %v220_v58  ;;  %v270_v7 = vld [vmem:[#allocation8 + $0x2] ss:$0 sm:$0xff] }
  0x2e   :  { %201 = vmatpush.msra.mxu3 %v157_v32  ;;  %262 = vmatpush.msrb.mxu1 %v214_v55  ;;  %v300_v20 = vld [vmem:[#allocation7 + $0x320] sm:$0xff]  ;;  %v350_v23 = vsub.f32 %v301_v19, %v320_v21  ;;  %v324_v32 = vand.u32 4294901760, %v299_v30 }
  0x2f   :  { %182 = vmatpush.msra.mxu2 %v140_v33  ;;  %241 = vmatpush.msrb.mxu0 %v219_v60  ;;  %v322_v22 = vand.u32 4294901760, %v300_v20  ;;  %v298_v33 = vld [vmem:[#allocation7 + $0x300] sm:$0xff] }
  0x30   :  { %202 = vmatpush.msra.mxu3 %v156_v35  ;;  %263 = vmatpush.msrb.mxu1 %v213_v57  ;;  %v326_v35 = vand.u32 4294901760, %v298_v33  ;;  %v302_v57 = vld [vmem:[#allocation8 + $0x3] ss:$0 sm:$0xff] }
  0x31   :  { %183 = vmatpush.msra.mxu2 %v139_v34  ;;  %521 = vmatmul.msk.f32.vlgmr.msrb.gmra.mxu0 %vm91_vm0, %v76_v62  ;;  %v356_v31 = vsub.f32 %v300_v20, %v322_v22  ;;  %v362_v34 = vsub.f32 %v299_v30, %v324_v32 }
  0x32   :  { %203 = vmatpush.msra.mxu3 %v155_v37  ;;  %264 = vmatpush.msrb.mxu1 %v212_v59  ;;  %v351_v37 = vand.u32 4294901760, %v350_v23 }
  0x33   :  { %184 = vmatpush.msra.mxu2 %v138_v36  ;;  %321 = vmatpush.msra.mxu0 %v320_v21  ;;  %v368_v36 = vsub.f32 %v298_v33, %v326_v35 }
  0x34   :  { %204 = vmatpush.msra.mxu3 %v154_v39  ;;  %265 = vmatpush.msrb.mxu1 %v211_v61  ;;  %v363_v39 = vand.u32 4294901760, %v362_v34 }
  0x35   :  { %185 = vmatpush.msra.mxu2 %v137_v38  ;;  %323 = vmatpush.msra.mxu0 %v322_v22  ;;  %v357_v38 = vand.u32 4294901760, %v356_v31  ;;  %v369_v42 = vand.u32 4294901760, %v368_v36 }
  0x36   :  { %205 = vmatpush.msra.mxu3 %v153_v40  ;;  %392 = vmatpush.msra.mxu1 %v350_v23  ;;  %v352_v40 = vsub.f32 %v350_v23, %v351_v37  ;;  %v364_v45 = vsub.f32 %v362_v34, %v363_v39 }
  0x37   :  { %481 = vmatpush.msrb.mxu2 %v320_v21  ;;  %325 = vmatpush.msra.mxu0 %v324_v32  ;;  %v358_v43 = vsub.f32 %v356_v31, %v357_v38  ;;  %v370_v46 = vsub.f32 %v368_v36, %v369_v42 }
  0x38   :  { %395 = vmatpush.msra.mxu1 %v356_v31  ;;  %v353_v41 = vand.u32 4294901760, %v352_v40 }
  0x39   :  { %483 = vmatpush.msrb.mxu2 %v322_v22  ;;  %327 = vmatpush.msra.mxu0 %v326_v35  ;;  %v359_v44 = vand.u32 4294901760, %v358_v43 }
  0x3a   :  { %398 = vmatpush.msra.mxu1 %v362_v34 }
  0x3b   :  { %485 = vmatpush.msrb.mxu2 %v324_v32  ;;  %354 = vmatpush.msrb.mxu0 %v353_v41 }
  0x3c   :  { %401 = vmatpush.msra.mxu1 %v368_v36 }
  0x3d   :  { %487 = vmatpush.msrb.mxu2 %v326_v35  ;;  %360 = vmatpush.msrb.mxu0 %v359_v44 }
  0x98   :  { %v112_v49 = vpop.f32.mrf.mxu0 }
  0x99   :  { %v132_v50 = vpop.f32.mrf.mxu1  ;;  %v113_v51 = vadd.f32 %v112_v49, %v87_v47  ;;  %v365_v47 = vand.u32 4294901760, %v364_v45 }
  0x9a   :  { %v133_v52 = vadd.f32 %v132_v50, %v88_v48  ;;  %v371_v48 = vand.u32 4294901760, %v370_v46 }
  0x9b   :  { %v135_v53 = vmax.f32 %v113_v51, 0.0  ;;  %366 = vmatpush.msrb.mxu0 %v365_v47 }
  0x9c   :  { %v136_v54 = vmax.f32 %v133_v52, 0.0 }
  0x9d   :  { %186 = vmatmul.f32.vlgmr.msra.gmra.mxu2 %v135_v53  ;;  %372 = vmatpush.msrb.mxu0 %v371_v48 }
  0x9e   :  { %206 = vmatmul.f32.vlgmr.msra.gmra.mxu3 %v136_v54 }
  0xae   :  { %v243_v5 = vpop.f32.mrf.mxu0 }
 0x120   :  { %v187_v0 = vpop.f32.mrf.mxu2 }
 0x121   :  { %v207_v1 = vpop.f32.mrf.mxu3  ;;  %v188_v2 = vadd.f32 %v187_v0, %v169_v63 }
 0x123   :  { %v208_v3 = vadd.f32 %v207_v1, %v188_v2 }
 0x125   :  { %v210_v4 = vmax.f32 %v208_v3, 0.0 }
 0x127   :  { %522 = vmatmul.msk.f32.vlgmr.msrb.gmra.mxu1 %vm246_vm1, %v210_v4 }
 0x128   :  { %450 = vmatpush.msrb.mxu1 %v351_v37 }
 0x12a   :  { %454 = vmatpush.msrb.mxu1 %v357_v38 }
 0x12c   :  { %458 = vmatpush.msrb.mxu1 %v363_v39 }
 0x12e   :  { %462 = vmatpush.msrb.mxu1 %v369_v42 }
 0x1a4   :  { %v267_v6 = vpop.f32.mrf.mxu1 }
 0x1a5   :  { %v268_v8 = vadd.f32 %v267_v6, %v243_v5  ;;  %v493_v5 = vlaneseq }
 0x1a7   :  { %v271_v9 = vadd.f32 %v270_v7, %v268_v8  ;;  %v494_v7 = vand.u32 127, %v493_v5 }
 0x1a9   :  { %277 = vrot.lane.b32.xlu0 %v271_v9, %s673_s2  ;;  %v272_v10 = vmul.f32 0.5, %v271_v9  ;;  %vm495_vm2 = vcmp.eq.s32.totalorder %v494_v7, 4 }
 0x1ab   :  { %533 = vtanh.f32 %v272_v10 }
 0x1b1   :  { %v534_v11 = vpop.eup %533 }
 0x1b2   :  { %v274_v12 = vadd.f32 1.0, %v534_v11 }
 0x1b4   :  { %v275_v13 = vmul.f32 0.5, %v274_v12 }
 0x1b6   :  { %v287_v25 = vsub.f32 1.0, %v275_v13 }
 0x21b   :  { %v278_v14 = vpop.permute.xlu0 %277 }
 0x21c   :  { %v280_v15 = vmul.f32 %v278_v14, %v275_v13 }
 0x21e   :  { %282 = vrot.lane.b32.xlu0 %v280_v15, %s674_s3 }
 0x290   :  { %v283_v16 = vpop.permute.xlu0 %282 }
 0x291   :  { %v285_v17 = vadd.f32 %v283_v16, %v271_v9 }
 0x293   :  { %535 = vtanh.f32 %v285_v17 }
 0x299   :  { %v536_v18 = vpop.eup %535 }
 0x29a   :  { %289 = vrot.lane.b32.xlu1 %v536_v18, %s675_s9 }
 0x2a2   :  { %293 = vrot.lane.b32.xlu1 %v76_v62, %s673_s2 }
 0x30c   :  { %v290_v24 = vpop.permute.xlu1 %289 }
 0x30d   :  { %v292_v27 = vmul.f32 %v290_v24, %v287_v25 }
 0x314   :  { %v294_v26 = vpop.permute.xlu1 %293 }
 0x315   :  { %v296_v28 = vmul.f32 %v294_v26, %v275_v13 }
 0x317   :  { %v297_v29 = vadd.f32 %v296_v28, %v292_v27 }
 0x319   :  { %304 = vrot.lane.b32.xlu2 %v297_v29, %s675_s9 }
 0x373   :  { %v305_v49 = vpop.permute.xlu2 %304 }
 0x374   :  { %v306_v50 = vsel %vm91_vm0, %v305_v49, 0 }
 0x375   :  { %v328_v51 = vand.u32 4294901760, %v306_v50 }
 0x377   :  { %v329_v52 = vsub.f32 %v306_v50, %v328_v51  ;;  %489 = vmatmul.f32.vlgmr.msrb.gmra.mxu2 %v328_v51 }
 0x379   :  { %v330_v53 = vand.u32 4294901760, %v329_v52  ;;  %404 = vmatmul.f32.vlgmr.msra.gmra.mxu1 %v329_v52 }
 0x37b   :  { %v331_v54 = vsub.f32 %v329_v52, %v330_v53 }
 0x37d   :  { %v332_v55 = vand.u32 4294901760, %v331_v54 }
 0x37f   :  { %333 = vmatmul.f32.vlgmr.msra.gmra.mxu0 %v332_v55 }
 0x380   :  { %421 = vmatpush.msra.mxu0 %v320_v21 }
 0x381   :  { %464 = vmatmul.f32.vlgmr.msrb.gmra.mxu1 %v328_v51 }
 0x382   :  { %423 = vmatpush.msra.mxu0 %v322_v22 }
 0x384   :  { %425 = vmatpush.msra.mxu0 %v324_v32 }
 0x386   :  { %427 = vmatpush.msra.mxu0 %v326_v35 }
 0x387   :  { %374 = vmatmul.f32.vlgmr.msrb.gmra.mxu0 %v328_v51 }
 0x38f   :  { %431 = vmatmul.f32.vlgmr.msra.gmra.mxu0 %v330_v53 }
 0x3f6   :  { %v405_v58 = vpop.f32.mrf.mxu1 }
 0x3fa   :  { %v490_v3 = vpop.f32.mrf.mxu2 }
 0x3fc   :  { %v334_v56 = vpop.f32.mrf.mxu0 }
 0x3fd   :  { %v335_v60 = vadd.f32 %v334_v56, %v302_v57 }
 0x3fe   :  { %v465_v1 = vpop.f32.mrf.mxu1 }
 0x404   :  { %v375_v59 = vpop.f32.mrf.mxu0 }
 0x405   :  { %v376_v61 = vadd.f32 %v375_v59, %v335_v60 }
 0x407   :  { %v406_v62 = vadd.f32 %v405_v58, %v376_v61 }
 0x40c   :  { %v432_v63 = vpop.f32.mrf.mxu0 }
 0x40d   :  { %v433_v0 = vadd.f32 %v432_v63, %v406_v62 }
 0x40f   :  { %v466_v2 = vadd.f32 %v465_v1, %v433_v0 }
 0x411   :  { %v491_v4 = vadd.f32 %v490_v3, %v466_v2 }
 0x413   :  { %v496_v6 = vmul.f32 1.442695, %v491_v4 }
 0x415   :  { %537 = vpow2.f32 %v496_v6 }
 0x41b   :  { %v538_v8 = vpop.eup %537 }
 0x41c   :  { %v498_v9 = vsel %vm495_vm2, %v538_v8, %v491_v4 }
 0x41d   :  { %499 = vst [vmem:[#allocation10] sm:$0xf] %v498_v9 }
 0x41e   :  { %510 = dma.vmem_to_hbm [thread:$0]  %s506_s11, 64, %s508_s14, [#allocation4]  }
 0x41f   :  { %665 = dma.done.wait [#allocation4], 64  }
 0x420   :  { %666 = vsyncadd [#allocation4], 4294967232 }
 0x421   :  { %515 = vsyncpa [#allocation3], 1 }
 0x422   :  { %516 = vsyncpa [#allocation6], 1 }
 0x423   :  { %517 = vsyncpa [#allocation9], 1 }
 0x424   :  { %518 = vsyncpa [#allocation4], 1 }

</bundles_post_ra>
